<compile_context>
chip_gen: v6e
topology: v6e:2x2x1
jax: 0.10.0
libtpu: 0.0.40
codegen_flags: <defaults>
</compile_context>

<pallas_src>
import jax
import jax.numpy as jnp
from jax.experimental import pallas as pl
from jax.experimental.pallas import tpu as pltpu

_LANE = 128
_NEG_FILL = -1e30  # padded-class bias; exp(-1e30 - m) == 0 in f32


def _round_up(n, m):
    return ((n + m - 1) // m) * m


def _softmax_regression_kernel(x_ref, w_ref, b_ref, logits_ref, probas_ref):
    # MXU matmul with f32 accumulation. x: (TB, F), w: (F, Cpad), b: (1, Cpad).
    x = x_ref[...]
    w = w_ref[...]
    b = b_ref[...]
    logits = jnp.dot(x, w, preferred_element_type=jnp.float32) + b  # (TB, Cpad)
    logits_ref[...] = logits.astype(logits_ref.dtype)

    # Numerically stable softmax along the class axis. Padded columns carry
    # logits ~ -1e30, so they contribute exp(...) == 0 and do not perturb the
    # real-class probabilities.
    m = jnp.max(logits, axis=1, keepdims=True)
    e = jnp.exp(logits - m)
    denom = jnp.sum(e, axis=1, keepdims=True)
    probas_ref[...] = (e * pl.reciprocal(denom, approx=True)).astype(probas_ref.dtype)


def prepare_params(weight, bias):
    """One-time parameter prep (hoisted out of the forward path).

    Args:
      weight: (C, F) float32 -- PyTorch nn.Linear convention.
      bias:   (C,)   float32
    Returns:
      w_t_pad: (F, Cpad) float32, pre-transposed, zero-padded classes.
      b_pad:   (1, Cpad) float32, padded classes filled with -1e30.
      C:       original number of classes.
    """
    C, F = weight.shape
    Cp = _round_up(max(C, 1), _LANE)
    w_t = jnp.asarray(weight, jnp.float32).T            # (F, C)
    b = jnp.asarray(bias, jnp.float32)                  # (C,)
    if Cp != C:
        w_t = jnp.pad(w_t, ((0, 0), (0, Cp - C)))
        b = jnp.pad(b, (0, Cp - C), constant_values=_NEG_FILL)
    return w_t, b.reshape(1, Cp), C


def softmax_regression_forward(
    x,
    w_t_pad,
    b_pad,
    num_classes,
    *,
    block_rows=None,
    vmem_limit_bytes=32 * 1024 * 1024,
    use_bf16_matmul=False,
):
    """Forward pass: logits = x @ W^T + b ; probas = softmax(logits, axis=1).

    Args:
      x:           (B, F) float32
      w_t_pad:     (F, Cpad) from prepare_params
      b_pad:       (1, Cpad) from prepare_params
      num_classes: original C (padding sliced off before returning)
    Returns:
      (logits, probas), each (B, num_classes) float32.
    """
    B, F = x.shape
    Cp = w_t_pad.shape[1]

    # ---- Row-tile size: as large as fits a conservative scoped-VMEM budget
    # (works across v5e/v6e 128 MiB and v7x 64 MiB VMEM).
    if block_rows is None:
        budget = int(0.75 * vmem_limit_bytes) - 2 * F * Cp * 4 - 2 * Cp * 4
        per_row = 4 * (2 * F + 4 * Cp)  # dbl-buffered x tile + two output tiles
        block_rows = min(512, budget // max(per_row, 1))
    block_rows = max(8, (int(block_rows) // 8) * 8)
    TB = min(block_rows, _round_up(B, 8))

    # Pad the batch to a whole number of row tiles (zero rows; sliced off).
    Bp = _round_up(B, TB)
    xp = x if Bp == B else jnp.pad(x, ((0, Bp - B), (0, 0)))
    grid = (Bp // TB,)

    w_in = w_t_pad
    if use_bf16_matmul:
        # v6e/v7x MXU peak needs bf16 operands; accumulation stays f32.
        xp = xp.astype(jnp.bfloat16)
        w_in = w_t_pad.astype(jnp.bfloat16)

    in_bytes = (
        xp.size * xp.dtype.itemsize
        + w_in.size * w_in.dtype.itemsize
        + Cp * 4
    )
    cost = pl.CostEstimate(
        flops=2 * Bp * F * Cp,
        transcendentals=Bp * Cp,                      # the exp in softmax
        bytes_accessed=in_bytes + 2 * Bp * Cp * 4,    # inputs + both outputs
    )

    logits_p, probas_p = pl.pallas_call(
        _softmax_regression_kernel,
        out_shape=(
            jax.ShapeDtypeStruct((Bp, Cp), jnp.float32),
            jax.ShapeDtypeStruct((Bp, Cp), jnp.float32),
        ),
        grid=grid,
        in_specs=[
            pl.BlockSpec((TB, F), lambda i: (i, 0)),   # x row tile (pipelined)
            pl.BlockSpec((F, Cp), lambda i: (0, 0)),   # weight: VMEM-resident
            pl.BlockSpec((1, Cp), lambda i: (0, 0)),   # bias:   VMEM-resident
        ],
        out_specs=(
            pl.BlockSpec((TB, Cp), lambda i: (i, 0)),
            pl.BlockSpec((TB, Cp), lambda i: (i, 0)),
        ),
        compiler_params=pltpu.CompilerParams(
            dimension_semantics=("parallel",),         # 2 TCs on v7x
            vmem_limit_bytes=vmem_limit_bytes,
        ),
        cost_estimate=cost,
    )(xp, w_in, b_pad)

    return logits_p[:B, :num_classes], probas_p[:B, :num_classes]


if __name__ == "__main__":
    # Shapes consistent with the module: batch=8, num_features=32, num_classes=4.
    B, F, C = 8, 32, 4
    key = jax.random.PRNGKey(0)
    kx, kw, kb = jax.random.split(key, 3)
    x = jax.random.normal(kx, (B, F), dtype=jnp.float32)

    # --- Case 1: module __init__ zeroes weight and bias deterministically.
    weight0 = jnp.zeros((C, F), dtype=jnp.float32)
    bias0 = jnp.zeros((C,), dtype=jnp.float32)
    w_pad0, b_pad0, _ = prepare_params(weight0, bias0)
    logits0, probas0 = softmax_regression_forward(x, w_pad0, b_pad0, C)
    jax.block_until_ready((logits0, probas0))
    ref_logits0 = x @ weight0.T + bias0
    ref_probas0 = jax.nn.softmax(ref_logits0, axis=1)
    assert logits0.shape == (B, C) and probas0.shape == (B, C)
    assert jnp.allclose(logits0, ref_logits0, atol=1e-5)
    assert jnp.allclose(probas0, ref_probas0, atol=2e-3)

    # --- Case 2: non-trivial weights to exercise the padded-softmax path.
    weight1 = 0.1 * jax.random.normal(kw, (C, F), dtype=jnp.float32)
    bias1 = 0.1 * jax.random.normal(kb, (C,), dtype=jnp.float32)
    w_pad1, b_pad1, _ = prepare_params(weight1, bias1)
    logits1, probas1 = softmax_regression_forward(x, w_pad1, b_pad1, C)
    jax.block_until_ready((logits1, probas1))
    ref_logits1 = x @ weight1.T + bias1
    ref_probas1 = jax.nn.softmax(ref_logits1, axis=1)
    assert jnp.allclose(logits1, ref_logits1, atol=1e-4)
    assert jnp.allclose(probas1, ref_probas1, atol=2e-3)

    print("KERNEL_OK")
</pallas_src>

<mosaic_0001>
module attributes {stable_mosaic.version = 11 : i64} {
  func.func @_softmax_regression_kernel(%arg0: i32, %arg1: memref<8x32xf32, #tpu.memory_space<vmem>>, %arg2: memref<32x128xf32, #tpu.memory_space<vmem>>, %arg3: memref<1x128xf32, #tpu.memory_space<vmem>>, %arg4: memref<8x128xf32, #tpu.memory_space<vmem>>, %arg5: memref<8x128xf32, #tpu.memory_space<vmem>>) attributes {dimension_semantics = [#tpu.dimension_semantics<parallel>], iteration_bounds = array<i64: 1>, scalar_prefetch = 0 : i64, scratch_operands = 0 : i64, tpu.core_type = #tpu.core_type<tc>, window_params = [{transform_indices = @transform_0, window_bounds = array<i64: 8, 32>}, {pipeline_mode = #tpu.pipeline_mode<synchronous>, transform_indices = @transform_1, window_bounds = array<i64: 32, 128>}, {pipeline_mode = #tpu.pipeline_mode<synchronous>, transform_indices = @transform_2, window_bounds = array<i64: 1, 128>}, {transform_indices = @transform_3, window_bounds = array<i64: 8, 128>}, {transform_indices = @transform_4, window_bounds = array<i64: 8, 128>}]} {
    %c0 = arith.constant 0 : index
    %c0_0 = arith.constant 0 : index
    %0 = vector.load %arg1[%c0, %c0_0] : memref<8x32xf32, #tpu.memory_space<vmem>>, vector<8x32xf32>
    %c0_1 = arith.constant 0 : index
    %c0_2 = arith.constant 0 : index
    %1 = vector.load %arg2[%c0_1, %c0_2] : memref<32x128xf32, #tpu.memory_space<vmem>>, vector<32x128xf32>
    %c0_3 = arith.constant 0 : index
    %c0_4 = arith.constant 0 : index
    %2 = vector.load %arg3[%c0_3, %c0_4] : memref<1x128xf32, #tpu.memory_space<vmem>>, vector<1x128xf32>
    %cst = arith.constant dense<0.000000e+00> : vector<8x128xf32>
    %3 = tpu.matmul %0, %1, %cst {dimension_numbers = #tpu.dot_dimension_numbers<[1], [0], [0], [1], [0, 0, 1, 1], [], []>} : vector<8x32xf32>, vector<32x128xf32>, vector<8x128xf32> -> vector<8x128xf32>
    %4 = vector.broadcast %2 : vector<1x128xf32> to vector<8x128xf32>
    %5 = arith.addf %3, %4 : vector<8x128xf32>
    %c0_5 = arith.constant 0 : index
    %c0_6 = arith.constant 0 : index
    %6 = vector.load %arg4[%c0_5, %c0_6] : memref<8x128xf32, #tpu.memory_space<vmem>>, vector<8x128xf32>
    tpu.vector_store %arg4[%c0_5, %c0_6], %5 {strides = array<i32>} : memref<8x128xf32, #tpu.memory_space<vmem>>, vector<8x128xf32>,
    %cst_7 = arith.constant dense<0xFF800000> : vector<8xf32>
    %7 = vector.multi_reduction <maximumf>, %5, %cst_7 [1] : vector<8x128xf32> to vector<8xf32>
    %8 = vector.shape_cast %7 : vector<8xf32> to vector<8x1xf32>
    %9 = vector.broadcast %8 : vector<8x1xf32> to vector<8x128xf32>
    %10 = arith.subf %5, %9 : vector<8x128xf32>
    %11 = math.exp %10 : vector<8x128xf32>
    %cst_8 = arith.constant dense<0.000000e+00> : vector<8xf32>
    %12 = vector.multi_reduction <add>, %11, %cst_8 [1] : vector<8x128xf32> to vector<8xf32>
    %13 = vector.shape_cast %12 : vector<8xf32> to vector<8x1xf32>
    %14 = tpu.reciprocal %13 {approx = true} : vector<8x1xf32> -> vector<8x1xf32>
    %15 = vector.broadcast %14 : vector<8x1xf32> to vector<8x128xf32>
    %16 = arith.mulf %11, %15 : vector<8x128xf32>
    %c0_9 = arith.constant 0 : index
    %c0_10 = arith.constant 0 : index
    %17 = vector.load %arg5[%c0_9, %c0_10] : memref<8x128xf32, #tpu.memory_space<vmem>>, vector<8x128xf32>
    tpu.vector_store %arg5[%c0_9, %c0_10], %16 {strides = array<i32>} : memref<8x128xf32, #tpu.memory_space<vmem>>, vector<8x128xf32>,
    return
  }
  func.func @transform_0(%arg0: i32) -> (i32, i32) {
    %c0_i32 = arith.constant 0 : i32
    %c0_i32_0 = arith.constant 0 : i32
    return %arg0, %c0_i32 : i32, i32
  }
  func.func @transform_1(%arg0: i32) -> (i32, i32) {
    %c0_i32 = arith.constant 0 : i32
    %c0_i32_0 = arith.constant 0 : i32
    %c0_i32_1 = arith.constant 0 : i32
    return %c0_i32, %c0_i32_0 : i32, i32
  }
  func.func @transform_2(%arg0: i32) -> (i32, i32) {
    %c0_i32 = arith.constant 0 : i32
    %c0_i32_0 = arith.constant 0 : i32
    %c0_i32_1 = arith.constant 0 : i32
    return %c0_i32, %c0_i32_0 : i32, i32
  }
  func.func @transform_3(%arg0: i32) -> (i32, i32) {
    %c0_i32 = arith.constant 0 : i32
    %c0_i32_0 = arith.constant 0 : i32
    return %arg0, %c0_i32 : i32, i32
  }
  func.func @transform_4(%arg0: i32) -> (i32, i32) {
    %c0_i32 = arith.constant 0 : i32
    %c0_i32_0 = arith.constant 0 : i32
    return %arg0, %c0_i32 : i32, i32
  }
}

</mosaic_0001>

<bundles_post_ra>
// kernel: tpu_custom_call.1
= control target key start
LH: loop header
LB: loop body
LE: loop exit
PB: predicated region body
PF: predicated region fallthrough
CT: control target
= control target key end

     0   :  { %10 = vsyncpa [#allocation3], 0  ;;  %s337_s0 = inlined_call_operand.hbm [shape: f32[8,32], index: 0, kind: input, shape index: {}]   ;;  %s338_s1 = inlined_call_operand.hbm [shape: f32[32,128], index: 1, kind: input, shape index: {}]   ;;  %s339_s2 = inlined_call_operand.vmem [shape: f32[1,128], index: 2, kind: input, shape index: {}]   ;;  %s340_s3 = inlined_call_operand.hbm [shape: f32[8,128], index: 3, kind: output, shape index: {0}]   ;;  %s341_s4 = inlined_call_operand.hbm [shape: f32[8,128], index: 4, kind: output, shape index: {1}]  }
   0x1   :  { %11 = vsyncpa [#allocation6], 0 }
   0x2   :  { %12 = vsyncpa [#allocation4], 0 }
   0x3   :  { %13 = vsyncpa [#allocation9], 0  ;;  %s289_s15 = smov [#allocation2]   ;;  %s290_s17 = smov [#allocation5]  }
   0x4   :  { %s20_s16 = sshll.u32 %s289_s15, 4  ;;  %s29_s18 = sshll.u32 %s290_s17, 4  ;;  %s21_s16 = int_to_ptr.vmem [resolvable:$true] %s20_s16  ;;  %s30_s18 = int_to_ptr.vmem [resolvable:$true] %s29_s18 }
   0x5   :  { %s209_s19 = scalar_lea.vmem %s21_s16, 128  ;;  %p214_p1 = scmp.lt.s32.totalorder %s21_s16, %s21_s16 }
   0x6   :  { %p210_p0 = scmp.ne.s32.totalorder %s21_s16, %s209_s19  ;;  %p215_p2 = scmp.lt.s32.totalorder %s209_s19, %s209_s19 }
   0x8   :  { %p216_p3 = por %p215_p2, %p214_p1 }
   0xa   :  { %p217_p4 = pnand %p216_p3, %p210_p0 }
   0xc   :  { %220 = shalt.err (!%p217_p4)
}
   0xd   :  { %23 = dma.hbm_to_vmem [thread:$0]  %s337_s0, 128, %s21_s16, [#allocation3]  }
   0xe   :  { %s229_s22 = scalar_lea.vmem %s30_s18, 512  ;;  %p234_p6 = scmp.lt.s32.totalorder %s30_s18, %s30_s18 }
   0xf   :  { %p230_p5 = scmp.ne.s32.totalorder %s30_s18, %s229_s22  ;;  %p235_p7 = scmp.lt.s32.totalorder %s229_s22, %s229_s22 }
  0x11   :  { %p236_p8 = por %p235_p7, %p234_p6 }
  0x13   :  { %p237_p9 = pnand %p236_p8, %p230_p5 }
  0x15   :  { %240 = shalt.err (!%p237_p9)
}
  0x16   :  { %s291_s23 = smov 128   ;;  %s292_s24 = smov 8  }
  0x17   :  { %35 = dma.hbm_to_vmem [thread:$0]  %s338_s1, 512, %s30_s18, [#allocation6], %s291_s23, %s291_s23, %s292_s24  }
  0x18   :  { %281 = dma.done.wait [#allocation3], 128  }
  0x19   :  { %282 = vsyncadd [#allocation3], 4294967168 }
  0x1a   :  { %283 = dma.done.wait [#allocation6], 512  }
  0x1b   :  { %284 = vsyncadd [#allocation6], 4294966784  ;;  %v293_v0 = vmov 0.0   ;;  %vm294_vm0 = vmmov 0   ;;  %v48_v1 = vld [vmem:[#allocation5 + $0x18] sm:$0xff]  ;;  %v47_v2 = vld [vmem:[#allocation5 + $0x10] sm:$0xff] }
  0x1c   :  { %178 = vmatprep.subr.mxu0 %v293_v0  ;;  %186 = vmatprep.mubr.msk.f32.mxu0 %vm294_vm0, %v293_v0  ;;  %v46_v3 = vld [vmem:[#allocation5 + $0x8] sm:$0xff]  ;;  %v45_v4 = vld [vmem:[#allocation5] sm:$0xff]  ;;  %v44_v5 = vld [vmem:[#allocation2] sm:$0xff]  ;;  %vm56_vm1 = vcmask 261120   ;;  %s295_s27 = smov [#allocation7]  }
  0x1d   :  { %179 = vmatpush3.msra.mxu0 %v48_v1  ;;  %v171_v6 = vld [vmem:[%s339_s2] ss:$0 sm:$0xff]  ;;  %s147_s28 = sshll.u32 %s295_s27, 4  ;;  %s148_s28 = int_to_ptr.vmem [resolvable:$true] %s147_s28 }
  0x1e   :  { %180 = vmatprep.subr.mxu0 %v293_v0  ;;  %s241_s29 = scalar_lea.vmem %s148_s28, 128  ;;  %p246_p11 = scmp.lt.s32.totalorder %s148_s28, %s148_s28 }
  0x1f   :  { %181 = vmatpush3.msra.mxu0 %v47_v2  ;;  %p242_p10 = scmp.ne.s32.totalorder %s148_s28, %s241_s29  ;;  %p247_p12 = scmp.lt.s32.totalorder %s241_s29, %s241_s29 }
  0x20   :  { %182 = vmatprep.subr.mxu0 %v293_v0 }
  0x21   :  { %183 = vmatpush3.msra.mxu0 %v46_v3  ;;  %p248_p13 = por %p247_p12, %p246_p11 }
  0x22   :  { %184 = vmatprep.subr.mxu0 %v293_v0 }
  0x23   :  { %185 = vmatpush3.msra.mxu0 %v45_v4  ;;  %p249_p0 = pnand %p248_p13, %p242_p10 }
  0x24   :  { %187 = vmatmul.mubr.msk.f32.vlgmr.msra.gmra.mxu0 %vm56_vm1, %v44_v5 }
  0xe4   :  { %v126_v7 = vpop.f32.mrf.mxu0 }
  0xe5   :  { %v127_v8 = vadd.f32 %v171_v6, %v126_v7 }
  0xe6   :  { %v188_v9 = vpop.f32.mrf.mxu0 }
  0xe7   :  { %130 = vst [vmem:[#allocation7] sm:$0xff] %v127_v8  ;;  %131 = vmax.xlane.f32.xlu0 %v127_v8 }
 0x170   :  { %v132_v10 = vpop.xlane.xlu0 %131 }
 0x171   :  { %v133_v11 = vsub.f32 %v127_v8, %v132_v10 }
 0x173   :  { %v134_v12 = vmul.f32 1.442695, %v133_v11 }
 0x175   :  { %197 = vpow2.f32 %v134_v12 }
 0x182   :  { %v198_v13 = vpop.eup %197 }
 0x183   :  { %136 = vadd.xlane.f32.xlu0 %v198_v13 }
 0x184   :  { %252 = shalt.err (!%p249_p0)
}
 0x185   :  { %150 = dma.vmem_to_hbm [thread:$0]  %s148_s28, 128, %s340_s3, [#allocation4]  }
 0x186   :  { %s296_s5 = smov [#allocation8]  }
 0x187   :  { %s157_s6 = sshll.u32 %s296_s5, 4  ;;  %s158_s6 = int_to_ptr.vmem [resolvable:$true] %s157_s6 }
 0x188   :  { %s261_s7 = scalar_lea.vmem %s158_s6, 128  ;;  %p266_p2 = scmp.lt.s32.totalorder %s158_s6, %s158_s6 }
 0x189   :  { %p262_p1 = scmp.ne.s32.totalorder %s158_s6, %s261_s7  ;;  %p267_p3 = scmp.lt.s32.totalorder %s261_s7, %s261_s7 }
 0x18b   :  { %p268_p4 = por %p267_p3, %p266_p2 }
 0x18d   :  { %p269_p5 = pnand %p268_p4, %p262_p1 }
 0x20c   :  { %v137_v14 = vpop.xlane.xlu0 %136 }
 0x20d   :  { %199 = vrcp.f32 %v137_v14 }
 0x21a   :  { %v200_v15 = vpop.eup %199 }
 0x21b   :  { %v139_v16 = vmul.f32 %v200_v15, %v198_v13 }
 0x21d   :  { %140 = vst [vmem:[#allocation8] sm:$0xff] %v139_v16 }
 0x21e   :  { %272 = shalt.err (!%p269_p5)
}
 0x21f   :  { %160 = dma.vmem_to_hbm [thread:$0]  %s158_s6, 128, %s341_s4, [#allocation9]  }
 0x220   :  { %285 = dma.done.wait [#allocation4], 128  }
 0x221   :  { %286 = vsyncadd [#allocation4], 4294967168 }
 0x222   :  { %287 = dma.done.wait [#allocation9], 128  }
 0x223   :  { %288 = vsyncadd [#allocation9], 4294967168 }
 0x224   :  { %167 = vsyncpa [#allocation3], 1 }
 0x225   :  { %168 = vsyncpa [#allocation6], 1 }
 0x226   :  { %169 = vsyncpa [#allocation4], 1 }
 0x227   :  { %170 = vsyncpa [#allocation9], 1 }

</bundles_post_ra>
